<compile_context>
chip_gen: v6e
topology: v6e:2x2x1
jax: 0.10.0
libtpu: 0.0.40
codegen_flags: <defaults>
</compile_context>

<pallas_src>
import math

import jax
import jax.numpy as jnp
from jax import lax
from jax.experimental import pallas as pl
from jax.experimental.pallas import tpu as pltpu


def _lstm_cell_kernel(x_ref, h_ref, c_ref, wih_ref, whh_ref, b_ref,
                      h_out_ref, c_out_ref):
    """Computes one (b_tile, h_tile) output tile of the LSTMCell step."""
    x = x_ref[...]                          # (b_tile, K_in)  native dtype -> MXU
    h = h_ref[...]                          # (b_tile, H)     native dtype -> MXU
    c = c_ref[...].astype(jnp.float32)      # (b_tile, h_tile)
    bias = b_ref[...].astype(jnp.float32)   # (4, h_tile)

    # Contract the last dim of both operands: x @ W[g].T with the weights kept
    # in PyTorch layout (no transpose in HBM or in the wrapper).
    dn = (((1,), (1,)), ((), ()))

    def gate_pre(g):
        acc = lax.dot_general(x, wih_ref[g], dn,
                              preferred_element_type=jnp.float32)
        acc = acc + lax.dot_general(h, whh_ref[g], dn,
                                    preferred_element_type=jnp.float32)
        return acc + bias[g:g + 1, :]       # (1, h_tile) broadcasts over rows

    # Gate order (i, f, g, o) -- PyTorch convention. Epilogue in f32.
    i_g = jax.nn.sigmoid(gate_pre(0))
    f_g = jax.nn.sigmoid(gate_pre(1))
    g_g = jnp.tanh(gate_pre(2))
    o_g = jax.nn.sigmoid(gate_pre(3))

    c_new = f_g * c + i_g * g_g
    h_new = o_g * jnp.tanh(c_new)

    h_out_ref[...] = h_new.astype(h_out_ref.dtype)
    c_out_ref[...] = c_new.astype(c_out_ref.dtype)


def _pick_hidden_tile(H):
    """Lane-dim tile of the hidden axis: multiple of 128 (prefer 256) or full H."""
    for t in (256, 128):
        if H % t == 0 and H > t:
            return t
    return H


def _pick_batch_tile(B):
    """Sublane-dim tile of the batch axis: multiple of 8 or full B."""
    for t in (256, 128, 64, 32, 16, 8):
        if B % t == 0 and B > t:
            return t
    return B


def lstm_cell(x, hx, w_ih, w_hh, b_ih=None, b_hh=None):
    """Pallas LSTMCell forward.

    Args:
      x:    (B, input_size)
      hx:   tuple (h, c), each (B, hidden_size), or None (zeros, like PyTorch)
      w_ih: (4*hidden_size, input_size)   -- PyTorch layout, gate order (i,f,g,o)
      w_hh: (4*hidden_size, hidden_size)  -- PyTorch layout
      b_ih, b_hh: (4*hidden_size,) or both None
    Returns:
      (h_new, c_new), each (B, hidden_size), dtype of x.
    """
    B, K_in = x.shape
    H4, K_w = w_ih.shape
    assert H4 % 4 == 0 and K_w == K_in
    H = H4 // 4
    assert w_hh.shape == (4 * H, H)

    if hx is None:
        z = jnp.zeros((B, H), dtype=x.dtype)
        hx = (z, z)
    h, c = hx
    assert h.shape == (B, H) and c.shape == (B, H)

    # Bias is all-or-nothing (matches PyTorch's bias=True/False).
    assert (b_ih is None) == (b_hh is None), "b_ih/b_hh must both be set or both None"
    if b_ih is None:
        bias = jnp.zeros((4, H), dtype=x.dtype)
    else:
        bias = (b_ih + b_hh).reshape(4, H)

    # Free, contiguous reshapes (no HBM transpose): (4H, K) -> (4, H, K).
    w_ih_r = w_ih.reshape(4, H, K_in)
    w_hh_r = w_hh.reshape(4, H, H)

    h_tile = _pick_hidden_tile(H)
    b_tile = _pick_batch_tile(B)
    nh = H // h_tile
    nb = B // b_tile
    grid = (nh, nb)   # batch innermost -> weight blocks stay resident across it

    # Rough VMEM budget (double-buffered blocks) -> explicit limit.
    act_isz = jnp.dtype(x.dtype).itemsize
    w_isz = jnp.dtype(w_ih.dtype).itemsize
    block_bytes = ((b_tile * K_in + b_tile * H + 3 * b_tile * h_tile
                    + 4 * h_tile) * act_isz
                   + 4 * h_tile * (K_in + H) * w_isz)
    # Note: re-derive tiles/limit for v7x (64 MiB physical VMEM).
    vmem_limit = int(min(max(3 * block_bytes, 16 * 1024 * 1024),
                         64 * 1024 * 1024))

    cost = pl.CostEstimate(
        flops=2 * B * (K_in + H) * 4 * H,
        transcendentals=5 * B * H,
        bytes_accessed=int((x.size + h.size + c.size + 2 * B * H) * act_isz
                           + (w_ih.size + w_hh.size) * w_isz
                           + bias.size * act_isz),
    )

    h_new, c_new = pl.pallas_call(
        _lstm_cell_kernel,
        out_shape=(
            jax.ShapeDtypeStruct((B, H), x.dtype),
            jax.ShapeDtypeStruct((B, H), x.dtype),
        ),
        grid=grid,
        in_specs=[
            pl.BlockSpec((b_tile, K_in), lambda hj, bi: (bi, 0)),        # x
            pl.BlockSpec((b_tile, H), lambda hj, bi: (bi, 0)),           # h
            pl.BlockSpec((b_tile, h_tile), lambda hj, bi: (bi, hj)),     # c
            pl.BlockSpec((4, h_tile, K_in), lambda hj, bi: (0, hj, 0)),  # W_ih
            pl.BlockSpec((4, h_tile, H), lambda hj, bi: (0, hj, 0)),     # W_hh
            pl.BlockSpec((4, h_tile), lambda hj, bi: (0, hj)),           # bias
        ],
        out_specs=(
            pl.BlockSpec((b_tile, h_tile), lambda hj, bi: (bi, hj)),
            pl.BlockSpec((b_tile, h_tile), lambda hj, bi: (bi, hj)),
        ),
        compiler_params=pltpu.CompilerParams(
            dimension_semantics=("parallel", "parallel"),
            vmem_limit_bytes=vmem_limit,
        ),
        cost_estimate=cost,
    )(x, h, c, w_ih_r, w_hh_r, bias)
    return h_new, c_new


def init_lstm_params(key, input_size, hidden_size, dtype=jnp.float32):
    """Matches torch's reset_parameters: U(-stdv, stdv), stdv = 1/sqrt(H)."""
    stdv = 1.0 / math.sqrt(hidden_size)
    k1, k2, k3, k4 = jax.random.split(key, 4)
    w_ih = jax.random.uniform(k1, (4 * hidden_size, input_size),
                              minval=-stdv, maxval=stdv, dtype=dtype)
    w_hh = jax.random.uniform(k2, (4 * hidden_size, hidden_size),
                              minval=-stdv, maxval=stdv, dtype=dtype)
    b_ih = jax.random.uniform(k3, (4 * hidden_size,),
                              minval=-stdv, maxval=stdv, dtype=dtype)
    b_hh = jax.random.uniform(k4, (4 * hidden_size,),
                              minval=-stdv, maxval=stdv, dtype=dtype)
    return w_ih, w_hh, b_ih, b_hh


def _reference_lstm_cell(x, hx, w_ih, w_hh, b_ih, b_hh):
    h, c = hx
    H = h.shape[1]
    x32, h32, c32 = (a.astype(jnp.float32) for a in (x, h, c))
    gates = (x32 @ w_ih.astype(jnp.float32).T + b_ih.astype(jnp.float32)
             + h32 @ w_hh.astype(jnp.float32).T + b_hh.astype(jnp.float32))
    i = jax.nn.sigmoid(gates[:, 0 * H:1 * H])
    f = jax.nn.sigmoid(gates[:, 1 * H:2 * H])
    g = jnp.tanh(gates[:, 2 * H:3 * H])
    o = jax.nn.sigmoid(gates[:, 3 * H:4 * H])
    c_new = f * c32 + i * g
    h_new = o * jnp.tanh(c_new)
    return h_new, c_new


if __name__ == "__main__":
    key = jax.random.PRNGKey(0)
    k_param, k_x, k_h, k_c = jax.random.split(key, 4)

    batch = 2
    input_size = 16
    hidden_size = 32

    w_ih, w_hh, b_ih, b_hh = init_lstm_params(k_param, input_size, hidden_size)
    x = jax.random.normal(k_x, (batch, input_size), dtype=jnp.float32)
    h0 = jax.random.normal(k_h, (batch, hidden_size), dtype=jnp.float32)
    c0 = jax.random.normal(k_c, (batch, hidden_size), dtype=jnp.float32)

    lstm_fn = jax.jit(lstm_cell)

    # --- f32 path: strict check against the pure-JAX reference. ---
    h_new, c_new = lstm_fn(x, (h0, c0), w_ih, w_hh, b_ih, b_hh)
    jax.block_until_ready((h_new, c_new))
    h_ref, c_ref = _reference_lstm_cell(x, (h0, c0), w_ih, w_hh, b_ih, b_hh)
    assert jnp.allclose(h_new, h_ref, atol=1e-5, rtol=1e-5)
    assert jnp.allclose(c_new, c_ref, atol=1e-5, rtol=1e-5)

    # --- hx=None path (zeros), as in the PyTorch forward. ---
    hz, cz = lstm_fn(x, None, w_ih, w_hh, b_ih, b_hh)
    jax.block_until_ready((hz, cz))
    hz_ref, cz_ref = _reference_lstm_cell(
        x, (jnp.zeros_like(h0), jnp.zeros_like(c0)), w_ih, w_hh, b_ih, b_hh)
    assert jnp.allclose(hz, hz_ref, atol=1e-5, rtol=1e-5)
    assert jnp.allclose(cz, cz_ref, atol=1e-5, rtol=1e-5)

    # --- bf16 operand path: MXU runs in bf16, accumulation/epilogue in f32. ---
    to_bf16 = lambda a: a.astype(jnp.bfloat16)
    hb, cb = lstm_fn(to_bf16(x), (to_bf16(h0), to_bf16(c0)),
                     to_bf16(w_ih), to_bf16(w_hh), to_bf16(b_ih), to_bf16(b_hh))
    jax.block_until_ready((hb, cb))
    hb_ref, cb_ref = _reference_lstm_cell(
        to_bf16(x), (to_bf16(h0), to_bf16(c0)),
        to_bf16(w_ih), to_bf16(w_hh), to_bf16(b_ih), to_bf16(b_hh))
    assert jnp.allclose(hb.astype(jnp.float32), hb_ref, atol=5e-2, rtol=5e-2)
    assert jnp.allclose(cb.astype(jnp.float32), cb_ref, atol=5e-2, rtol=5e-2)

    print("KERNEL_OK")
</pallas_src>

<mosaic_0001>
module attributes {stable_mosaic.version = 11 : i64} {
  func.func @_lstm_cell_kernel(%arg0: i32, %arg1: i32, %arg2: memref<2x16xf32, #tpu.memory_space<vmem>>, %arg3: memref<2x32xf32, #tpu.memory_space<vmem>>, %arg4: memref<2x32xf32, #tpu.memory_space<vmem>>, %arg5: memref<4x32x16xf32, #tpu.memory_space<vmem>>, %arg6: memref<4x32x32xf32, #tpu.memory_space<vmem>>, %arg7: memref<4x32xf32, #tpu.memory_space<vmem>>, %arg8: memref<2x32xf32, #tpu.memory_space<vmem>>, %arg9: memref<2x32xf32, #tpu.memory_space<vmem>>) attributes {dimension_semantics = [#tpu.dimension_semantics<parallel>, #tpu.dimension_semantics<parallel>], iteration_bounds = array<i64: 1, 1>, scalar_prefetch = 0 : i64, scratch_operands = 0 : i64, tpu.core_type = #tpu.core_type<tc>, window_params = [{transform_indices = @transform_0, window_bounds = array<i64: 2, 16>}, {transform_indices = @transform_1, window_bounds = array<i64: 2, 32>}, {transform_indices = @transform_2, window_bounds = array<i64: 2, 32>}, {transform_indices = @transform_3, window_bounds = array<i64: 4, 32, 16>}, {transform_indices = @transform_4, window_bounds = array<i64: 4, 32, 32>}, {transform_indices = @transform_5, window_bounds = array<i64: 4, 32>}, {transform_indices = @transform_6, window_bounds = array<i64: 2, 32>}, {transform_indices = @transform_7, window_bounds = array<i64: 2, 32>}]} {
    %c0 = arith.constant 0 : index
    %c0_0 = arith.constant 0 : index
    %0 = vector.load %arg2[%c0, %c0_0] : memref<2x16xf32, #tpu.memory_space<vmem>>, vector<2x16xf32>
    %c0_1 = arith.constant 0 : index
    %c0_2 = arith.constant 0 : index
    %1 = vector.load %arg3[%c0_1, %c0_2] : memref<2x32xf32, #tpu.memory_space<vmem>>, vector<2x32xf32>
    %c0_3 = arith.constant 0 : index
    %c0_4 = arith.constant 0 : index
    %2 = vector.load %arg4[%c0_3, %c0_4] : memref<2x32xf32, #tpu.memory_space<vmem>>, vector<2x32xf32>
    %c0_5 = arith.constant 0 : index
    %c0_6 = arith.constant 0 : index
    %3 = vector.load %arg7[%c0_5, %c0_6] : memref<4x32xf32, #tpu.memory_space<vmem>>, vector<4x32xf32>
    %c0_7 = arith.constant 0 : index
    %c0_8 = arith.constant 0 : index
    %c0_9 = arith.constant 0 : index
    %4 = vector.load %arg5[%c0_7, %c0_8, %c0_9] : memref<4x32x16xf32, #tpu.memory_space<vmem>>, vector<1x32x16xf32>
    %5 = vector.shape_cast %4 : vector<1x32x16xf32> to vector<32x16xf32>
    %cst = arith.constant dense<0.000000e+00> : vector<2x32xf32>
    %6 = tpu.matmul %0, %5, %cst {dimension_numbers = #tpu.dot_dimension_numbers<[1], [1], [0], [0], [0, 0, 1, 0], [], []>} : vector<2x16xf32>, vector<32x16xf32>, vector<2x32xf32> -> vector<2x32xf32>
    %c0_10 = arith.constant 0 : index
    %c0_11 = arith.constant 0 : index
    %c0_12 = arith.constant 0 : index
    %7 = vector.load %arg6[%c0_10, %c0_11, %c0_12] : memref<4x32x32xf32, #tpu.memory_space<vmem>>, vector<1x32x32xf32>
    %8 = vector.shape_cast %7 : vector<1x32x32xf32> to vector<32x32xf32>
    %cst_13 = arith.constant dense<0.000000e+00> : vector<2x32xf32>
    %9 = tpu.matmul %1, %8, %cst_13 {dimension_numbers = #tpu.dot_dimension_numbers<[1], [1], [0], [0], [0, 0, 1, 0], [], []>} : vector<2x32xf32>, vector<32x32xf32>, vector<2x32xf32> -> vector<2x32xf32>
    %10 = arith.addf %6, %9 : vector<2x32xf32>
    %11 = vector.extract_strided_slice %3 {offsets = [0, 0], sizes = [1, 32], strides = [1, 1]} : vector<4x32xf32> to vector<1x32xf32>
    %12 = vector.broadcast %11 : vector<1x32xf32> to vector<2x32xf32>
    %13 = arith.addf %10, %12 : vector<2x32xf32>
    %14 = arith.negf %13 : vector<2x32xf32>
    %15 = math.exp %14 : vector<2x32xf32>
    %cst_14 = arith.constant 1.000000e+00 : f32
    %16 = vector.broadcast %cst_14 : f32 to vector<2x32xf32>
    %17 = arith.addf %16, %15 : vector<2x32xf32>
    %18 = arith.divf %16, %17 : vector<2x32xf32>
    %c1 = arith.constant 1 : index
    %c0_15 = arith.constant 0 : index
    %c0_16 = arith.constant 0 : index
    %19 = vector.load %arg5[%c1, %c0_15, %c0_16] : memref<4x32x16xf32, #tpu.memory_space<vmem>>, vector<1x32x16xf32>
    %20 = vector.shape_cast %19 : vector<1x32x16xf32> to vector<32x16xf32>
    %cst_17 = arith.constant dense<0.000000e+00> : vector<2x32xf32>
    %21 = tpu.matmul %0, %20, %cst_17 {dimension_numbers = #tpu.dot_dimension_numbers<[1], [1], [0], [0], [0, 0, 1, 0], [], []>} : vector<2x16xf32>, vector<32x16xf32>, vector<2x32xf32> -> vector<2x32xf32>
    %c1_18 = arith.constant 1 : index
    %c0_19 = arith.constant 0 : index
    %c0_20 = arith.constant 0 : index
    %22 = vector.load %arg6[%c1_18, %c0_19, %c0_20] : memref<4x32x32xf32, #tpu.memory_space<vmem>>, vector<1x32x32xf32>
    %23 = vector.shape_cast %22 : vector<1x32x32xf32> to vector<32x32xf32>
    %cst_21 = arith.constant dense<0.000000e+00> : vector<2x32xf32>
    %24 = tpu.matmul %1, %23, %cst_21 {dimension_numbers = #tpu.dot_dimension_numbers<[1], [1], [0], [0], [0, 0, 1, 0], [], []>} : vector<2x32xf32>, vector<32x32xf32>, vector<2x32xf32> -> vector<2x32xf32>
    %25 = arith.addf %21, %24 : vector<2x32xf32>
    %26 = vector.extract_strided_slice %3 {offsets = [1, 0], sizes = [1, 32], strides = [1, 1]} : vector<4x32xf32> to vector<1x32xf32>
    %27 = vector.broadcast %26 : vector<1x32xf32> to vector<2x32xf32>
    %28 = arith.addf %25, %27 : vector<2x32xf32>
    %29 = arith.negf %28 : vector<2x32xf32>
    %30 = math.exp %29 : vector<2x32xf32>
    %cst_22 = arith.constant 1.000000e+00 : f32
    %31 = vector.broadcast %cst_22 : f32 to vector<2x32xf32>
    %32 = arith.addf %31, %30 : vector<2x32xf32>
    %33 = arith.divf %31, %32 : vector<2x32xf32>
    %c2 = arith.constant 2 : index
    %c0_23 = arith.constant 0 : index
    %c0_24 = arith.constant 0 : index
    %34 = vector.load %arg5[%c2, %c0_23, %c0_24] : memref<4x32x16xf32, #tpu.memory_space<vmem>>, vector<1x32x16xf32>
    %35 = vector.shape_cast %34 : vector<1x32x16xf32> to vector<32x16xf32>
    %cst_25 = arith.constant dense<0.000000e+00> : vector<2x32xf32>
    %36 = tpu.matmul %0, %35, %cst_25 {dimension_numbers = #tpu.dot_dimension_numbers<[1], [1], [0], [0], [0, 0, 1, 0], [], []>} : vector<2x16xf32>, vector<32x16xf32>, vector<2x32xf32> -> vector<2x32xf32>
    %c2_26 = arith.constant 2 : index
    %c0_27 = arith.constant 0 : index
    %c0_28 = arith.constant 0 : index
    %37 = vector.load %arg6[%c2_26, %c0_27, %c0_28] : memref<4x32x32xf32, #tpu.memory_space<vmem>>, vector<1x32x32xf32>
    %38 = vector.shape_cast %37 : vector<1x32x32xf32> to vector<32x32xf32>
    %cst_29 = arith.constant dense<0.000000e+00> : vector<2x32xf32>
    %39 = tpu.matmul %1, %38, %cst_29 {dimension_numbers = #tpu.dot_dimension_numbers<[1], [1], [0], [0], [0, 0, 1, 0], [], []>} : vector<2x32xf32>, vector<32x32xf32>, vector<2x32xf32> -> vector<2x32xf32>
    %40 = arith.addf %36, %39 : vector<2x32xf32>
    %41 = vector.extract_strided_slice %3 {offsets = [2, 0], sizes = [1, 32], strides = [1, 1]} : vector<4x32xf32> to vector<1x32xf32>
    %42 = vector.broadcast %41 : vector<1x32xf32> to vector<2x32xf32>
    %43 = arith.addf %40, %42 : vector<2x32xf32>
    %44 = math.tanh %43 : vector<2x32xf32>
    %c3 = arith.constant 3 : index
    %c0_30 = arith.constant 0 : index
    %c0_31 = arith.constant 0 : index
    %45 = vector.load %arg5[%c3, %c0_30, %c0_31] : memref<4x32x16xf32, #tpu.memory_space<vmem>>, vector<1x32x16xf32>
    %46 = vector.shape_cast %45 : vector<1x32x16xf32> to vector<32x16xf32>
    %cst_32 = arith.constant dense<0.000000e+00> : vector<2x32xf32>
    %47 = tpu.matmul %0, %46, %cst_32 {dimension_numbers = #tpu.dot_dimension_numbers<[1], [1], [0], [0], [0, 0, 1, 0], [], []>} : vector<2x16xf32>, vector<32x16xf32>, vector<2x32xf32> -> vector<2x32xf32>
    %c3_33 = arith.constant 3 : index
    %c0_34 = arith.constant 0 : index
    %c0_35 = arith.constant 0 : index
    %48 = vector.load %arg6[%c3_33, %c0_34, %c0_35] : memref<4x32x32xf32, #tpu.memory_space<vmem>>, vector<1x32x32xf32>
    %49 = vector.shape_cast %48 : vector<1x32x32xf32> to vector<32x32xf32>
    %cst_36 = arith.constant dense<0.000000e+00> : vector<2x32xf32>
    %50 = tpu.matmul %1, %49, %cst_36 {dimension_numbers = #tpu.dot_dimension_numbers<[1], [1], [0], [0], [0, 0, 1, 0], [], []>} : vector<2x32xf32>, vector<32x32xf32>, vector<2x32xf32> -> vector<2x32xf32>
    %51 = arith.addf %47, %50 : vector<2x32xf32>
    %52 = vector.extract_strided_slice %3 {offsets = [3, 0], sizes = [1, 32], strides = [1, 1]} : vector<4x32xf32> to vector<1x32xf32>
    %53 = vector.broadcast %52 : vector<1x32xf32> to vector<2x32xf32>
    %54 = arith.addf %51, %53 : vector<2x32xf32>
    %55 = arith.negf %54 : vector<2x32xf32>
    %56 = math.exp %55 : vector<2x32xf32>
    %cst_37 = arith.constant 1.000000e+00 : f32
    %57 = vector.broadcast %cst_37 : f32 to vector<2x32xf32>
    %58 = arith.addf %57, %56 : vector<2x32xf32>
    %59 = arith.divf %57, %58 : vector<2x32xf32>
    %60 = arith.mulf %33, %2 : vector<2x32xf32>
    %61 = arith.mulf %18, %44 : vector<2x32xf32>
    %62 = arith.addf %60, %61 : vector<2x32xf32>
    %63 = math.tanh %62 : vector<2x32xf32>
    %64 = arith.mulf %59, %63 : vector<2x32xf32>
    %c0_38 = arith.constant 0 : index
    %c0_39 = arith.constant 0 : index
    %65 = vector.load %arg8[%c0_38, %c0_39] : memref<2x32xf32, #tpu.memory_space<vmem>>, vector<2x32xf32>
    tpu.vector_store %arg8[%c0_38, %c0_39], %64 {strides = array<i32>} : memref<2x32xf32, #tpu.memory_space<vmem>>, vector<2x32xf32>,
    %c0_40 = arith.constant 0 : index
    %c0_41 = arith.constant 0 : index
    %66 = vector.load %arg9[%c0_40, %c0_41] : memref<2x32xf32, #tpu.memory_space<vmem>>, vector<2x32xf32>
    tpu.vector_store %arg9[%c0_40, %c0_41], %62 {strides = array<i32>} : memref<2x32xf32, #tpu.memory_space<vmem>>, vector<2x32xf32>,
    return
  }
  func.func @transform_0(%arg0: i32, %arg1: i32) -> (i32, i32) {
    %c0_i32 = arith.constant 0 : i32
    %c0_i32_0 = arith.constant 0 : i32
    return %arg1, %c0_i32 : i32, i32
  }
  func.func @transform_1(%arg0: i32, %arg1: i32) -> (i32, i32) {
    %c0_i32 = arith.constant 0 : i32
    %c0_i32_0 = arith.constant 0 : i32
    return %arg1, %c0_i32 : i32, i32
  }
  func.func @transform_2(%arg0: i32, %arg1: i32) -> (i32, i32) {
    %c0_i32 = arith.constant 0 : i32
    return %arg1, %arg0 : i32, i32
  }
  func.func @transform_3(%arg0: i32, %arg1: i32) -> (i32, i32, i32) {
    %c0_i32 = arith.constant 0 : i32
    %c0_i32_0 = arith.constant 0 : i32
    %c0_i32_1 = arith.constant 0 : i32
    return %c0_i32, %arg0, %c0_i32_0 : i32, i32, i32
  }
  func.func @transform_4(%arg0: i32, %arg1: i32) -> (i32, i32, i32) {
    %c0_i32 = arith.constant 0 : i32
    %c0_i32_0 = arith.constant 0 : i32
    %c0_i32_1 = arith.constant 0 : i32
    return %c0_i32, %arg0, %c0_i32_0 : i32, i32, i32
  }
  func.func @transform_5(%arg0: i32, %arg1: i32) -> (i32, i32) {
    %c0_i32 = arith.constant 0 : i32
    %c0_i32_0 = arith.constant 0 : i32
    return %c0_i32, %arg0 : i32, i32
  }
  func.func @transform_6(%arg0: i32, %arg1: i32) -> (i32, i32) {
    %c0_i32 = arith.constant 0 : i32
    return %arg1, %arg0 : i32, i32
  }
  func.func @transform_7(%arg0: i32, %arg1: i32) -> (i32, i32) {
    %c0_i32 = arith.constant 0 : i32
    return %arg1, %arg0 : i32, i32
  }
}

</mosaic_0001>

<bundles_post_ra>
// kernel: lstm_cell.1
= control target key start
LH: loop header
LB: loop body
LE: loop exit
PB: predicated region body
PF: predicated region fallthrough
CT: control target
= control target key end

     0   :  { %13 = vsyncpa [#allocation3], 0  ;;  %vm39_vm0 = vcmask 261120   ;;  %vm125_vm1 = vcmask 130048   ;;  %v1067_v2 = vmov 0.0   ;;  %vm1068_vm2 = vmmov 0   ;;  %s1327_s0 = inlined_call_operand.vmem [shape: f32[2,16], index: 0, kind: input, shape index: {}]   ;;  %s1328_s1 = inlined_call_operand.vmem [shape: f32[2,32], index: 1, kind: input, shape index: {}]   ;;  %s1329_s2 = inlined_call_operand.vmem [shape: f32[2,32], index: 2, kind: input, shape index: {}]   ;;  %s1330_s3 = inlined_call_operand.vmem [shape: f32[4,32,16], index: 3, kind: input, shape index: {}]   ;;  %s1331_s4 = inlined_call_operand.vmem [shape: f32[4,32,32], index: 4, kind: input, shape index: {}]   ;;  %s1332_s5 = inlined_call_operand.vmem [shape: f32[4,32], index: 5, kind: input, shape index: {}]   ;;  %s1333_s6 = inlined_call_operand.hbm [shape: f32[2,32], index: 6, kind: output, shape index: {0}]   ;;  %s1334_s7 = inlined_call_operand.hbm [shape: f32[2,32], index: 7, kind: output, shape index: {1}]  }
   0x1   :  { %v38_v0 = vld [vmem:[%s1331_s4 + $0x18] sm:$0xff]  ;;  %915 = vmatprep.subr.mxu0 %v1067_v2  ;;  %926 = vmatprep.subr.mxu1 %v1067_v2  ;;  %v37_v3 = vld [vmem:[%s1331_s4 + $0x10] sm:$0xff]  ;;  %v36_v5 = vld [vmem:[%s1331_s4 + $0x8] sm:$0xff] }
   0x2   :  { %v34_v1 = vld [vmem:[%s1330_s3 + $0x18] sm:$0xff]  ;;  %916 = vmatpush3.xpose.msk.msra.mxu0 %vm39_vm0, %v38_v0  ;;  %v33_v4 = vld [vmem:[%s1330_s3 + $0x10] sm:$0xff]  ;;  %923 = vmatprep.mubr.msk.f32.mxu0 %vm1068_vm2, %v1067_v2  ;;  %v32_v6 = vld [vmem:[%s1330_s3 + $0x8] sm:$0xff] }
   0x3   :  { %927 = vmatpush3.xpose.msk.msra.mxu1 %vm125_vm1, %v34_v1  ;;  %917 = vmatprep.subr.mxu0 %v1067_v2  ;;  %v35_v7 = vld [vmem:[%s1331_s4] sm:$0xff] }
   0x4   :  { %928 = vmatprep.subr.mxu1 %v1067_v2  ;;  %934 = vmatprep.mubr.msk.f32.mxu1 %vm1068_vm2, %v1067_v2  ;;  %v31_v8 = vld [vmem:[%s1330_s3] sm:$0xff] }
   0x6   :  { %918 = vmatpush3.xpose.msk.msra.mxu0 %vm39_vm0, %v37_v3 }
   0x7   :  { %929 = vmatpush3.xpose.msk.msra.mxu1 %vm125_vm1, %v33_v4  ;;  %919 = vmatprep.subr.mxu0 %v1067_v2 }
   0x8   :  { %930 = vmatprep.subr.mxu1 %v1067_v2 }
   0xa   :  { %920 = vmatpush3.xpose.msk.msra.mxu0 %vm39_vm0, %v36_v5 }
   0xb   :  { %931 = vmatpush3.xpose.msk.msra.mxu1 %vm125_vm1, %v32_v6  ;;  %921 = vmatprep.subr.mxu0 %v1067_v2 }
   0xc   :  { %932 = vmatprep.subr.mxu1 %v1067_v2 }
   0xd   :  { %14 = vsyncpa [#allocation5], 0  ;;  %v1158_v9 = vld [vmem:[%s1328_s1] sm:$0x3]  ;;  %v826_v11 = vld [vmem:[%s1331_s4 + $0x38] sm:$0xff]  ;;  %v211_v35 = vlaneseq  ;;  %s1069_s20 = smov [#allocation4]  }
   0xe   :  { %922 = vmatpush3.xpose.msk.msra.mxu0 %vm39_vm0, %v35_v7  ;;  %v1163_v10 = vld [vmem:[%s1327_s0] sm:$0x3]  ;;  %v822_v12 = vld [vmem:[%s1330_s3 + $0x38] sm:$0xff]  ;;  %v825_v13 = vld [vmem:[%s1331_s4 + $0x30] sm:$0xff]  ;;  %s796_s21 = sshll.u32 %s1069_s20, 4  ;;  %vm777_vm3 = vcmask 254976   ;;  %s797_s21 = int_to_ptr.vmem [resolvable:$true] %s796_s21 }
   0xf   :  { %933 = vmatpush3.xpose.msk.msra.mxu1 %vm125_vm1, %v31_v8  ;;  %937 = vmatprep.subr.mxu0 %v1067_v2  ;;  %v821_v14 = vld [vmem:[%s1330_s3 + $0x30] sm:$0xff]  ;;  %v824_v15 = vld [vmem:[%s1331_s4 + $0x28] sm:$0xff]  ;;  %v823_v17 = vld [vmem:[%s1331_s4 + $0x20] sm:$0xff]  ;;  %v212_v36 = vshrl.u32 %v211_v35, 7  ;;  %s1023_s22 = scalar_lea.vmem %s797_s21, 32  ;;  %p1028_p1 = scmp.lt.s32.totalorder %s797_s21, %s797_s21 }
  0x10   :  { %948 = vmatprep.subr.mxu1 %v1067_v2  ;;  %v820_v16 = vld [vmem:[%s1330_s3 + $0x28] sm:$0xff]  ;;  %v819_v18 = vld [vmem:[%s1330_s3 + $0x20] sm:$0xff]  ;;  %v845_v19 = vld [vmem:[%s1331_s4 + $0x58] sm:$0xff]  ;;  %p1024_p0 = scmp.ne.s32.totalorder %s797_s21, %s1023_s22  ;;  %p1029_p2 = scmp.lt.s32.totalorder %s1023_s22, %s1023_s22 }
  0x11   :  { %924 = vmatmul.mubr.msk.f32.vlgmr.msra.gmra.mxu0 %vm39_vm0, %v1158_v9  ;;  %v841_v20 = vld [vmem:[%s1330_s3 + $0x58] sm:$0xff]  ;;  %v844_v21 = vld [vmem:[%s1331_s4 + $0x50] sm:$0xff]  ;;  %v843_v23 = vld [vmem:[%s1331_s4 + $0x48] sm:$0xff]  ;;  %v213_v41 = vsub.s32 0, %v212_v36  ;;  %v398_v46 = vsub.s32 1, %v212_v36  ;;  %v583_v56 = vsub.s32 2, %v212_v36 }
  0x12   :  { %935 = vmatmul.mubr.msk.f32.vlgmr.msra.gmra.mxu1 %vm125_vm1, %v1163_v10  ;;  %938 = vmatpush3.xpose.msk.msra.mxu0 %vm39_vm0, %v826_v11  ;;  %v840_v22 = vld [vmem:[%s1330_s3 + $0x50] sm:$0xff]  ;;  %v839_v24 = vld [vmem:[%s1330_s3 + $0x48] sm:$0xff]  ;;  %v842_v25 = vld [vmem:[%s1331_s4 + $0x40] sm:$0xff]  ;;  %v763_v4 = vsub.s32 3, %v212_v36  ;;  %p1030_p3 = por %p1029_p2, %p1028_p1 }
  0x13   :  { %949 = vmatpush3.xpose.msk.msra.mxu1 %vm125_vm1, %v822_v12  ;;  %939 = vmatprep.subr.mxu0 %v1067_v2  ;;  %v838_v26 = vld [vmem:[%s1330_s3 + $0x40] sm:$0xff]  ;;  %v863_v27 = vld [vmem:[%s1331_s4 + $0x78] sm:$0xff]  ;;  %v862_v29 = vld [vmem:[%s1331_s4 + $0x70] sm:$0xff] }
  0x14   :  { %950 = vmatprep.subr.mxu1 %v1067_v2  ;;  %945 = vmatprep.mubr.msk.f32.mxu0 %vm1068_vm2, %v1067_v2  ;;  %v859_v28 = vld [vmem:[%s1330_s3 + $0x78] sm:$0xff]  ;;  %v858_v30 = vld [vmem:[%s1330_s3 + $0x70] sm:$0xff]  ;;  %v861_v31 = vld [vmem:[%s1331_s4 + $0x68] sm:$0xff]  ;;  %p1031_p4 = pnand %p1030_p3, %p1024_p0 }
  0x15   :  { %956 = vmatprep.mubr.msk.f32.mxu1 %vm1068_vm2, %v1067_v2  ;;  %v857_v32 = vld [vmem:[%s1330_s3 + $0x68] sm:$0xff]  ;;  %v860_v33 = vld [vmem:[%s1331_s4 + $0x60] sm:$0xff] }
  0x16   :  { %940 = vmatpush3.xpose.msk.msra.mxu0 %vm39_vm0, %v825_v13  ;;  %v856_v34 = vld [vmem:[%s1330_s3 + $0x60] sm:$0xff] }
  0x17   :  { %951 = vmatpush3.xpose.msk.msra.mxu1 %vm125_vm1, %v821_v14  ;;  %941 = vmatprep.subr.mxu0 %v1067_v2  ;;  %v30_v42 = vld [vmem:[%s1332_s5] sm:$0xf] }
  0x18   :  { %952 = vmatprep.subr.mxu1 %v1067_v2  ;;  %v214_v44 = vrot.slane %v30_v42, %v213_v41  ;;  %v399_v48 = vrot.slane %v30_v42, %v398_v46  ;;  %v584_v57 = vrot.slane %v30_v42, %v583_v56  ;;  %v764_v5 = vrot.slane %v30_v42, %v763_v4  ;;  %v29_v13 = vld [vmem:[%s1329_s2] sm:$0x3] }
  0x1a   :  { %942 = vmatpush3.xpose.msk.msra.mxu0 %vm39_vm0, %v824_v15 }
  0x1b   :  { %953 = vmatpush3.xpose.msk.msra.mxu1 %vm125_vm1, %v820_v16  ;;  %943 = vmatprep.subr.mxu0 %v1067_v2 }
  0x1c   :  { %954 = vmatprep.subr.mxu1 %v1067_v2 }
  0x1e   :  { %944 = vmatpush3.xpose.msk.msra.mxu0 %vm39_vm0, %v823_v17 }
  0x1f   :  { %955 = vmatpush3.xpose.msk.msra.mxu1 %vm125_vm1, %v819_v18  ;;  %959 = vmatprep.subr.mxu0 %v1067_v2 }
  0x20   :  { %970 = vmatprep.subr.mxu1 %v1067_v2 }
  0x21   :  { %946 = vmatmul.mubr.msk.f32.vlgmr.msra.gmra.mxu0 %vm39_vm0, %v1158_v9 }
  0x22   :  { %957 = vmatmul.mubr.msk.f32.vlgmr.msra.gmra.mxu1 %vm125_vm1, %v1163_v10  ;;  %960 = vmatpush3.xpose.msk.msra.mxu0 %vm39_vm0, %v845_v19 }
  0x23   :  { %971 = vmatpush3.xpose.msk.msra.mxu1 %vm125_vm1, %v841_v20  ;;  %961 = vmatprep.subr.mxu0 %v1067_v2 }
  0x24   :  { %972 = vmatprep.subr.mxu1 %v1067_v2  ;;  %967 = vmatprep.mubr.msk.f32.mxu0 %vm1068_vm2, %v1067_v2 }
  0x25   :  { %978 = vmatprep.mubr.msk.f32.mxu1 %vm1068_vm2, %v1067_v2 }
  0x26   :  { %962 = vmatpush3.xpose.msk.msra.mxu0 %vm39_vm0, %v844_v21 }
  0x27   :  { %973 = vmatpush3.xpose.msk.msra.mxu1 %vm125_vm1, %v840_v22  ;;  %963 = vmatprep.subr.mxu0 %v1067_v2 }
  0x28   :  { %974 = vmatprep.subr.mxu1 %v1067_v2 }
  0x2a   :  { %964 = vmatpush3.xpose.msk.msra.mxu0 %vm39_vm0, %v843_v23 }
  0x2b   :  { %975 = vmatpush3.xpose.msk.msra.mxu1 %vm125_vm1, %v839_v24  ;;  %965 = vmatprep.subr.mxu0 %v1067_v2 }
  0x2c   :  { %976 = vmatprep.subr.mxu1 %v1067_v2 }
  0x2e   :  { %966 = vmatpush3.xpose.msk.msra.mxu0 %vm39_vm0, %v842_v25 }
  0x2f   :  { %977 = vmatpush3.xpose.msk.msra.mxu1 %vm125_vm1, %v838_v26  ;;  %981 = vmatprep.subr.mxu0 %v1067_v2 }
  0x30   :  { %992 = vmatprep.subr.mxu1 %v1067_v2 }
  0x31   :  { %968 = vmatmul.mubr.msk.f32.vlgmr.msra.gmra.mxu0 %vm39_vm0, %v1158_v9 }
  0x32   :  { %979 = vmatmul.mubr.msk.f32.vlgmr.msra.gmra.mxu1 %vm125_vm1, %v1163_v10  ;;  %982 = vmatpush3.xpose.msk.msra.mxu0 %vm39_vm0, %v863_v27 }
  0x33   :  { %993 = vmatpush3.xpose.msk.msra.mxu1 %vm125_vm1, %v859_v28  ;;  %983 = vmatprep.subr.mxu0 %v1067_v2 }
  0x34   :  { %994 = vmatprep.subr.mxu1 %v1067_v2  ;;  %989 = vmatprep.mubr.msk.f32.mxu0 %vm1068_vm2, %v1067_v2 }
  0x35   :  { %1000 = vmatprep.mubr.msk.f32.mxu1 %vm1068_vm2, %v1067_v2 }
  0x36   :  { %984 = vmatpush3.xpose.msk.msra.mxu0 %vm39_vm0, %v862_v29 }
  0x37   :  { %995 = vmatpush3.xpose.msk.msra.mxu1 %vm125_vm1, %v858_v30  ;;  %985 = vmatprep.subr.mxu0 %v1067_v2 }
  0x38   :  { %996 = vmatprep.subr.mxu1 %v1067_v2 }
  0x3a   :  { %986 = vmatpush3.xpose.msk.msra.mxu0 %vm39_vm0, %v861_v31 }
  0x3b   :  { %997 = vmatpush3.xpose.msk.msra.mxu1 %vm125_vm1, %v857_v32  ;;  %987 = vmatprep.subr.mxu0 %v1067_v2 }
  0x3c   :  { %998 = vmatprep.subr.mxu1 %v1067_v2 }
  0x3e   :  { %988 = vmatpush3.xpose.msk.msra.mxu0 %vm39_vm0, %v860_v33 }
  0x3f   :  { %999 = vmatpush3.xpose.msk.msra.mxu1 %vm125_vm1, %v856_v34 }
  0x41   :  { %990 = vmatmul.mubr.msk.f32.vlgmr.msra.gmra.mxu0 %vm39_vm0, %v1158_v9 }
  0x42   :  { %1001 = vmatmul.mubr.msk.f32.vlgmr.msra.gmra.mxu1 %vm125_vm1, %v1163_v10 }
  0xd1   :  { %v121_v37 = vpop.f32.mrf.mxu0 }
  0xd2   :  { %v207_v38 = vpop.f32.mrf.mxu1 }
  0xd3   :  { %v925_v39 = vpop.f32.mrf.mxu0  ;;  %v208_v43 = vadd.f32 %v207_v38, %v121_v37 }
  0xd4   :  { %v936_v40 = vpop.f32.mrf.mxu1 }
  0xd5   :  { %v215_v45 = vadd.f32 %v214_v44, %v208_v43 }
  0xd7   :  { %v818_v47 = vmul.f32 -1.442695, %v215_v45 }
  0xd9   :  { %1007 = vpow2.f32 %v818_v47 }
  0xe1   :  { %v310_v49 = vpop.f32.mrf.mxu0 }
  0xe2   :  { %v392_v50 = vpop.f32.mrf.mxu1 }
  0xe3   :  { %v393_v51 = vadd.f32 %v392_v50, %v310_v49  ;;  %v947_v52 = vpop.f32.mrf.mxu0 }
  0xe4   :  { %v958_v53 = vpop.f32.mrf.mxu1 }
  0xe5   :  { %v400_v54 = vadd.f32 %v399_v48, %v393_v51 }
  0xe6   :  { %v1008_v58 = vpop.eup %1007 }
  0xe7   :  { %v837_v55 = vmul.f32 -1.442695, %v400_v54  ;;  %v219_v0 = vadd.f32 1.0, %v1008_v58 }
  0xe9   :  { %1009 = vpow2.f32 %v837_v55 }
  0xf1   :  { %v495_v59 = vpop.f32.mrf.mxu0 }
  0xf2   :  { %v577_v60 = vpop.f32.mrf.mxu1 }
  0xf3   :  { %v578_v61 = vadd.f32 %v577_v60, %v495_v59  ;;  %v969_v62 = vpop.f32.mrf.mxu0 }
  0xf4   :  { %v980_v63 = vpop.f32.mrf.mxu1 }
  0xf5   :  { %v585_v1 = vadd.f32 %v584_v57, %v578_v61 }
  0xf6   :  { %v1010_v2 = vpop.eup %1009 }
  0xf7   :  { %v404_v3 = vadd.f32 1.0, %v1010_v2  ;;  %1011 = vtanh.f32 %v585_v1 }
  0xf8   :  { %1013 = vrcp.f32 %v219_v0 }
  0xf9   :  { %1015 = vrcp.f32 %v404_v3 }
 0x101   :  { %v675_v6 = vpop.f32.mrf.mxu0 }
 0x102   :  { %v757_v7 = vpop.f32.mrf.mxu1 }
 0x103   :  { %v758_v8 = vadd.f32 %v757_v7, %v675_v6  ;;  %v991_v9 = vpop.f32.mrf.mxu0 }
 0x104   :  { %v1002_v10 = vpop.f32.mrf.mxu1  ;;  %v1012_v11 = vpop.eup %1011 }
 0x105   :  { %v765_v12 = vadd.f32 %v764_v5, %v758_v8  ;;  %v1014_v14 = vpop.eup %1013 }
 0x106   :  { %v1016_v15 = vpop.eup %1015  ;;  %v773_v17 = vmul.f32 %v1014_v14, %v1012_v11 }
 0x107   :  { %v874_v16 = vmul.f32 -1.442695, %v765_v12  ;;  %v772_v18 = vmul.f32 %v1016_v15, %v29_v13 }
 0x109   :  { %1017 = vpow2.f32 %v874_v16  ;;  %v774_v19 = vadd.f32 %v773_v17, %v772_v18 }
 0x10b   :  { %779 = vst.msk [vmem:[#allocation4] sm:$0x3] %vm777_vm3, %v774_v19 }
 0x10c   :  { %1034 = shalt.err (!%p1031_p4)
}
 0x10d   :  { %799 = dma.vmem_to_hbm [thread:$0]  %s797_s21, 32, %s1334_s7, [#allocation5]   ;;  %1019 = vtanh.f32 %v774_v19 }
 0x10e   :  { %s1070_s24 = smov [#allocation2]  }
 0x10f   :  { %s786_s0 = sshll.u32 %s1070_s24, 4  ;;  %s787_s0 = int_to_ptr.vmem [resolvable:$true] %s786_s0 }
 0x110   :  { %s1043_s1 = scalar_lea.vmem %s787_s0, 32  ;;  %p1048_p6 = scmp.lt.s32.totalorder %s787_s0, %s787_s0 }
 0x111   :  { %p1044_p5 = scmp.ne.s32.totalorder %s787_s0, %s1043_s1  ;;  %p1049_p7 = scmp.lt.s32.totalorder %s1043_s1, %s1043_s1 }
 0x113   :  { %p1050_p8 = por %p1049_p7, %p1048_p6 }
 0x115   :  { %p1051_p9 = pnand %p1050_p8, %p1044_p5 }
 0x116   :  { %v1018_v20 = vpop.eup %1017 }
 0x117   :  { %v769_v21 = vadd.f32 1.0, %v1018_v20 }
 0x119   :  { %1021 = vrcp.f32 %v769_v21 }
 0x11a   :  { %v1020_v22 = vpop.eup %1019 }
 0x126   :  { %v1022_v23 = vpop.eup %1021 }
 0x127   :  { %v776_v24 = vmul.f32 %v1022_v23, %v1020_v22 }
 0x129   :  { %778 = vst.msk [vmem:[#allocation2] sm:$0x3] %vm777_vm3, %v776_v24 }
 0x12a   :  { %1054 = shalt.err (!%p1051_p9)
}
 0x12b   :  { %789 = dma.vmem_to_hbm [thread:$0]  %s787_s0, 32, %s1333_s6, [#allocation3]  }
 0x12c   :  { %1063 = dma.done.wait [#allocation3], 32  }
 0x12d   :  { %1064 = vsyncadd [#allocation3], 4294967264 }
 0x12e   :  { %1065 = dma.done.wait [#allocation5], 32  }
 0x12f   :  { %1066 = vsyncadd [#allocation5], 4294967264 }
 0x130   :  { %806 = vsyncpa [#allocation3], 1 }
 0x131   :  { %807 = vsyncpa [#allocation5], 1 }

</bundles_post_ra>
